<compile_context>
chip_gen: v7x
topology: tpu7x:2x2x1
jax: 0.10.0
libtpu: 0.0.40
codegen_flags: <defaults>
</compile_context>

<pallas_src>
import functools

import numpy as np

import jax
import jax.numpy as jnp
from jax import lax
from jax.experimental import pallas as pl
from jax.experimental.pallas import tpu as pltpu

ALPHA = 0.9      # nn.Module: self.alpha = 0.9
GAMMA = 1e-4     # nn.Module: gamma buffer (default 0.0001)


# --------------------------- small helpers ----------------------------------

def _round_up(x, m):
    return ((x + m - 1) // m) * m


def _sublane_multiple(itemsize):
    # sublane packing: f32 -> 8, bf16 -> 16, int8/fp8 -> 32
    return {1: 32, 2: 16, 4: 8}.get(int(itemsize), 8)


def _device_kind():
    try:
        return jax.devices()[0].device_kind.lower()
    except Exception:  # pragma: no cover - defensive
        return ""


def _vmem_cap_bytes(kind):
    """Upper bound for vmem_limit_bytes, always leaving compiler headroom."""
    try:
        info = pltpu.get_tpu_info()
        cap = int(getattr(info, "vmem_capacity_bytes"))
        return max(8 << 20, cap - (12 << 20))
    except Exception:
        pass
    if "v7" in kind:
        return 52 << 20           # 64 MiB physical per TC -> leave 12 MiB free
    if "v2" in kind or "v3" in kind:
        return 12 << 20
    return 96 << 20               # v4/v5e/v6e: 128 MiB physical


def _pass_budget_bytes(kind, cap):
    if "v7" in kind:
        tgt = 44 << 20
    elif "v5" in kind:
        tgt = 48 << 20            # bumped from 4 MiB-per-tile era
    else:                         # v6e / v4 / unknown
        tgt = 64 << 20
    return max(4 << 20, min(tgt, cap - (4 << 20)))


def _vmem_limit(need, cap):
    lo = min(32 << 20, cap)
    return int(min(cap, max(lo, need + (4 << 20))))


def _largest_tile_d(d_pad, elt_bytes, budget):
    """Largest multiple-of-128 divisor of d_pad whose two resident
    (d_pad, tile_d) buffers fit in `budget` bytes."""
    k = d_pad // 128
    for m in range(k, 0, -1):
        if k % m == 0 and 2 * d_pad * (m * 128) * elt_bytes <= budget:
            return m * 128
    return 128


def _fix_tile_d(tile_d, d_pad, default_td):
    if tile_d is None:
        return default_td
    td = max(128, (int(tile_d) // 128) * 128)
    while d_pad % td:
        td -= 128
    return max(128, td)


def _fix_tile_n(tile_n, n, sub):
    tn = max(sub, (int(tile_n) // sub) * sub)
    return min(tn, _round_up(n, sub))


def _choose_cov_tiles(n, d_pad, x_esize, kind, budget):
    """Pass-1 tiles: big N tile (amortizes the D^2 f32 accumulator RMW)."""
    sub = _sublane_multiple(x_esize)
    tile_d = _largest_tile_d(d_pad, 4, max(budget * 2 // 5, 2 * d_pad * 128 * 4))
    cov_bytes = 2 * d_pad * tile_d * 4
    mxu = 128 if "v5" in kind else 256
    target_rows = 1024 if "v5" in kind else 2048
    rows_budget = max(sub, (budget - cov_bytes) // max(1, 2 * d_pad * x_esize))
    tile_n = min(target_rows, rows_budget, _round_up(n, sub))
    align = mxu if tile_n >= mxu else sub        # fill the MXU contraction K
    tile_n = max(sub, (tile_n // align) * align)
    return tile_n, tile_d


def _choose_apply_tiles(n, d_pad, x_esize, mat_esize, kind, budget):
    """Pass-2 tiles: X + Y double buffers + resident cov all fit the budget."""
    sub = _sublane_multiple(x_esize)
    tile_d = _largest_tile_d(d_pad, mat_esize,
                             max(budget // 3, 2 * d_pad * 128 * mat_esize))
    cov_bytes = 2 * d_pad * tile_d * mat_esize
    per_row = 2 * d_pad * x_esize + 2 * tile_d * x_esize
    rows_budget = max(sub, (budget - cov_bytes) // max(1, per_row))
    tile_n = min(1024, rows_budget, _round_up(n, sub))
    tile_n = max(sub, (tile_n // sub) * sub)
    return tile_n, tile_d


# --------------------------- kernels -----------------------------------------

def _cov_partial_kernel(x_ref, cov_ref, *, tile_n, tile_d, n_col_blocks,
                        rows_total, row_tiles_per_split, mask_rows, cast_bf16):
    """partial_cov[s, :, j-block] = sum_i X_tile(i)^T @ X_tile(i)[:, j-block]."""
    s = pl.program_id(0)
    j = pl.program_id(1)
    i = pl.program_id(2)

    @pl.when(i == 0)
    def _init():
        cov_ref[...] = jnp.zeros_like(cov_ref)

    mask = None
    if mask_rows:
        row_start = (s * row_tiles_per_split + i) * tile_n
        row_ids = lax.broadcasted_iota(jnp.int32, (tile_n, 1), 0)
        mask = row_ids < (rows_total - row_start)

    def _prep(v):
        if mask is not None:
            v = jnp.where(mask, v, jnp.zeros_like(v))
        if cast_bf16:
            v = v.astype(jnp.bfloat16)
        return v

    x = _prep(x_ref[...])                               # (tile_n, d_pad)
    if n_col_blocks == 1:
        x_cols = x
    else:
        start = pl.multiple_of(j * tile_d, tile_d)
        x_cols = _prep(x_ref[:, pl.ds(start, tile_d)])  # (tile_n, tile_d)

    # X^T @ X[:, j-block], accumulated in f32 in the resident output block.
    cov_ref[...] += lax.dot_general(
        x, x_cols, (((0,), (0,)), ((), ())),
        preferred_element_type=jnp.float32)


def _apply_kernel(x_ref, cov_ref, y_ref, *, tile_d, n_col_blocks, cast_bf16):
    """Y[:, j-block] = X[:, j-block] - gamma * X @ cov[:, j-block]."""
    j = pl.program_id(1)
    x = x_ref[...]
    xm = x.astype(jnp.bfloat16) if cast_bf16 else x
    # cov is already in the matmul dtype (cast hoisted into the wrapper).
    xc = jnp.dot(xm, cov_ref[...], preferred_element_type=jnp.float32)
    if n_col_blocks == 1:
        xs = x
    else:
        start = pl.multiple_of(j * tile_d, tile_d)
        xs = x_ref[:, pl.ds(start, tile_d)]
    y_ref[...] = (xs.astype(jnp.float32) - GAMMA * xc).astype(y_ref.dtype)


# --------------------------- wrapper ------------------------------------------

def annihilation_forward(x, running_cov, *, training=True, first_call=False,
                         matmul_in_bf16=False, num_core_splits=None,
                         tile_n_cov=None, tile_n_apply=None,
                         tile_d_cov=None, tile_d_apply=None):
    """Returns (Y, new_running_cov, props) — mirrors the PyTorch forward.

    `running_cov` is the (D, D) f32 state.  PyTorch's "uninitialized zeros(1)"
    state corresponds to first_call=True (or a non-(D, D) running_cov), in
    which case cov_new == X^T X / N exactly and running_cov is never read.
    """
    n, d = x.shape
    props = {"lc": GAMMA, "rc": GAMMA}
    x_esize = jnp.dtype(x.dtype).itemsize
    kind = _device_kind()
    cap = _vmem_cap_bytes(kind)
    budget = _pass_budget_bytes(kind, cap)
    sub = _sublane_multiple(x_esize)

    if training and (running_cov.ndim != 2 or running_cov.shape != (d, d)):
        first_call = True              # mirrors `running_cov.shape[0] == 1`

    # Matmul operand dtype; the cov cast is done once here, not per grid step.
    mat_dtype = (jnp.bfloat16 if (matmul_in_bf16 or x.dtype == jnp.bfloat16)
                 else x.dtype)
    cast_bf16 = jnp.dtype(mat_dtype) != jnp.dtype(x.dtype)
    mat_esize = jnp.dtype(mat_dtype).itemsize

    # Only D is padded (and only when not already lane-aligned); the N axis uses
    # cdiv grids + an in-kernel row mask (pass 1) / discarded OOB writes (pass 2),
    # so there is no jnp.pad / output-slice HBM round trip on the big axis.
    d_pad = _round_up(d, 128)
    xp = x if d_pad == d else jnp.pad(x, ((0, 0), (0, d_pad - d)))
    # TODO(synk): a fused in-kernel column mask could avoid this D pad as well.

    # ---------------- pass 1: covariance update (training only) --------------
    if training:
        tn1_def, td1_def = _choose_cov_tiles(n, d_pad, x_esize, kind, budget)
        tile_n1 = tn1_def if tile_n_cov is None else _fix_tile_n(tile_n_cov, n, sub)
        tile_d1 = _fix_tile_d(tile_d_cov, d_pad, td1_def)
        n_col1 = d_pad // tile_d1

        row_tiles = pl.cdiv(n, tile_n1)
        if num_core_splits is None:
            splits = 2 if ("v7" in kind or "v4" in kind) else 1
        else:
            splits = max(1, int(num_core_splits))
        if splits > 1 and row_tiles % splits != 0:
            splits = 1                 # keep every X block start in-bounds
        rps = row_tiles // splits
        mask_rows = (n % tile_n1) != 0

        need1 = 2 * tile_n1 * d_pad * x_esize + 2 * d_pad * tile_d1 * 4
        cost1 = pl.CostEstimate(
            flops=int(2 * n * d_pad * d_pad),
            transcendentals=0,
            bytes_accessed=int(n * d_pad * x_esize * n_col1
                               + splits * d_pad * d_pad * 4))

        partial = pl.pallas_call(
            functools.partial(
                _cov_partial_kernel, tile_n=tile_n1, tile_d=tile_d1,
                n_col_blocks=n_col1, rows_total=n, row_tiles_per_split=rps,
                mask_rows=mask_rows, cast_bf16=cast_bf16),
            out_shape=jax.ShapeDtypeStruct((splits, d_pad, d_pad), jnp.float32),
            grid=(splits, n_col1, rps),
            in_specs=[pl.BlockSpec((tile_n1, d_pad),
                                   lambda s, j, i: (s * rps + i, 0))],
            out_specs=pl.BlockSpec((None, d_pad, tile_d1),
                                   lambda s, j, i: (s, 0, j)),
            compiler_params=pltpu.CompilerParams(
                dimension_semantics=("parallel", "arbitrary", "arbitrary"),
                vmem_limit_bytes=_vmem_limit(need1, cap)),
            cost_estimate=cost1,
        )(xp)

        # Split-reduce + 1/N + EMA: a single D^2-sized XLA epilogue.
        w = partial.sum(axis=0) * (1.0 / n)
        if first_call:
            cov_new_p = w
        else:
            cov_old_p = running_cov.astype(jnp.float32)
            if d_pad != d:
                cov_old_p = jnp.pad(cov_old_p, ((0, d_pad - d), (0, d_pad - d)))
            cov_new_p = ALPHA * cov_old_p + (1.0 - ALPHA) * w
        cov_new = cov_new_p if d_pad == d else cov_new_p[:d, :d]
    else:
        cov_new_p = running_cov.astype(jnp.float32)
        if d_pad != d:
            cov_new_p = jnp.pad(cov_new_p, ((0, d_pad - d), (0, d_pad - d)))
        cov_new = running_cov

    cov_for_apply = cov_new_p.astype(mat_dtype)     # cast hoisted out of kernel

    # ---------------- pass 2: Y = X - gamma * X @ cov ------------------------
    tn2_def, td2_def = _choose_apply_tiles(n, d_pad, x_esize, mat_esize, kind,
                                           budget)
    tile_n2 = tn2_def if tile_n_apply is None else _fix_tile_n(tile_n_apply, n, sub)
    tile_d2 = _fix_tile_d(tile_d_apply, d_pad, td2_def)
    n_col2 = d_pad // tile_d2
    row_tiles2 = pl.cdiv(n, tile_n2)

    need2 = (2 * tile_n2 * d_pad * x_esize        # X double buffer
             + 2 * tile_n2 * tile_d2 * x_esize    # Y double buffer
             + 2 * d_pad * tile_d2 * mat_esize)   # resident cov block(s)
    cost2 = pl.CostEstimate(
        flops=int(2 * n * d_pad * d_pad + 3 * n * d_pad),
        transcendentals=0,
        bytes_accessed=int(2 * n * d_pad * x_esize
                           + d_pad * d_pad * mat_esize
                           * (1 if n_col2 == 1 else row_tiles2)))

    # NOTE: if profiling ever shows exposed DMA here, the X spec can take
    # pipeline_mode=pl.Buffered(3) — the corrected VMEM budget leaves headroom.
    yp = pl.pallas_call(
        functools.partial(_apply_kernel, tile_d=tile_d2, n_col_blocks=n_col2,
                          cast_bf16=cast_bf16),
        out_shape=jax.ShapeDtypeStruct((n, d_pad), x.dtype),
        grid=(row_tiles2, n_col2),
        in_specs=[pl.BlockSpec((tile_n2, d_pad), lambda i, j: (i, 0)),
                  pl.BlockSpec((d_pad, tile_d2), lambda i, j: (0, j))],
        out_specs=pl.BlockSpec((tile_n2, tile_d2), lambda i, j: (i, j)),
        compiler_params=pltpu.CompilerParams(
            dimension_semantics=("parallel", "arbitrary"),
            vmem_limit_bytes=_vmem_limit(need2, cap)),
        cost_estimate=cost2,
    )(xp, cov_for_apply)
    y = yp if d_pad == d else yp[:, :d]

    return y, cov_new, props


# --------------------------- reference & self-test ----------------------------

def _to64(a):
    return np.asarray(jnp.asarray(a, jnp.float32), dtype=np.float64)


def _reference(x, cov, training, first_call):
    x64 = _to64(x)
    n = x.shape[0]
    if training:
        w = x64.T @ x64 / n
        cov_new = w if first_call else (ALPHA * np.asarray(cov, np.float64)
                                        + (1.0 - ALPHA) * w)
    else:
        cov_new = np.asarray(cov, np.float64)
    y = x64 - GAMMA * (x64 @ cov_new)
    return y, cov_new


def _assert_close(name, got, want, atol, rtol):
    got64 = _to64(got)
    want64 = np.asarray(want, np.float64)
    ok = np.allclose(got64, want64, atol=atol, rtol=rtol)
    assert ok, (f"{name} mismatch: max abs err "
                f"{np.max(np.abs(got64 - want64)):.3e}")


if __name__ == "__main__":
    key = jax.random.PRNGKey(0)
    ks = jax.random.split(key, 4)

    # ---- test 1: aligned shapes, multiple N tiles, forced 2-way core split,
    #              first-call -> EMA -> eval chain ----------------------------
    N, D = 256, 128
    x1 = jax.random.normal(ks[0], (N, D), jnp.float32)
    x2 = jax.random.normal(ks[1], (N, D), jnp.float32) + 1.0   # mean-shifted
    cov0 = jnp.zeros((1,), jnp.float32)          # PyTorch "uninitialized" state

    y1, cov1, props = annihilation_forward(
        x1, cov0, training=True, first_call=True, num_core_splits=2,
        tile_n_cov=64, tile_n_apply=64)
    y2, cov2, _ = annihilation_forward(
        x2, cov1, training=True, first_call=False, num_core_splits=2,
        tile_n_cov=64, tile_n_apply=64)
    y3, cov3, _ = annihilation_forward(x2, cov2, training=False)
    jax.block_until_ready((y1, cov1, y2, cov2, y3, cov3))

    ry1, rcov1 = _reference(x1, None, True, True)
    ry2, rcov2 = _reference(x2, rcov1, True, False)
    ry3, _ = _reference(x2, rcov2, False, False)
    _assert_close("cov1", cov1, rcov1, 3e-3, 3e-3)
    _assert_close("y1", y1, ry1, 3e-4, 1e-4)
    _assert_close("cov2", cov2, rcov2, 3e-3, 3e-3)
    _assert_close("y2", y2, ry2, 3e-4, 1e-4)
    _assert_close("y3", y3, ry3, 3e-4, 1e-4)
    assert jnp.allclose(cov3, cov2)              # eval must not update state
    assert props == {"lc": GAMMA, "rc": GAMMA}

    # ---- test 2: unaligned N and D (row mask + D padding path) --------------
    Nu, Du = 45, 72
    xu = jax.random.normal(ks[2], (Nu, Du), jnp.float32)
    yu, covu, _ = annihilation_forward(
        xu, jnp.zeros((Du, Du), jnp.float32), training=True, first_call=True,
        tile_n_cov=16, tile_n_apply=16)
    jax.block_until_ready((yu, covu))
    ryu, rcovu = _reference(xu, None, True, True)
    assert yu.shape == (Nu, Du) and covu.shape == (Du, Du)
    _assert_close("covu", covu, rcovu, 3e-3, 3e-3)
    _assert_close("yu", yu, ryu, 3e-4, 1e-4)

    # ---- test 3: bf16 activations, default (auto) tiles ---------------------
    xb = jax.random.normal(ks[3], (64, 128), jnp.float32).astype(jnp.bfloat16)
    yb, covb, _ = annihilation_forward(xb, jnp.zeros((1,), jnp.float32),
                                       training=True, first_call=True)
    jax.block_until_ready((yb, covb))
    assert yb.dtype == jnp.bfloat16
    ryb, rcovb = _reference(xb, None, True, True)
    _assert_close("covb", covb, rcovb, 3e-3, 3e-3)
    _assert_close("yb", yb, ryb, 3e-2, 2e-2)

    # ---- test 4: D-column tiling + core split + bf16-matmul flag (f32 data) -
    xd = jax.random.normal(jax.random.PRNGKey(7), (64, 256), jnp.float32)
    yd, covd, _ = annihilation_forward(
        xd, jnp.zeros((1,), jnp.float32), training=True, first_call=True,
        num_core_splits=2, matmul_in_bf16=True,
        tile_n_cov=32, tile_n_apply=32, tile_d_cov=128, tile_d_apply=128)
    jax.block_until_ready((yd, covd))
    ryd, rcovd = _reference(xd, None, True, True)
    _assert_close("covd", covd, rcovd, 5e-3, 5e-3)
    _assert_close("yd", yd, ryd, 3e-4, 1e-4)

    print("KERNEL_OK")
</pallas_src>

<mosaic_0001>
module attributes {stable_mosaic.version = 11 : i64} {
  func.func @_cov_partial_kernel(%arg0: i32, %arg1: i32, %arg2: i32, %arg3: memref<64x128xf32, #tpu.memory_space<vmem>>, %arg4: memref<1x128x128xf32, #tpu.memory_space<vmem>>) attributes {dimension_semantics = [#tpu.dimension_semantics<parallel>, #tpu.dimension_semantics<arbitrary>, #tpu.dimension_semantics<arbitrary>], iteration_bounds = array<i64: 2, 1, 2>, scalar_prefetch = 0 : i64, scratch_operands = 0 : i64, tpu.core_type = #tpu.core_type<tc>, window_params = [{transform_indices = @transform_0, window_bounds = array<i64: 64, 128>}, {transform_indices = @transform_1, window_bounds = array<i64: 1, 128, 128>}]} {
    %c0_i32 = arith.constant 0 : i32
    %0 = arith.cmpi eq, %arg2, %c0_i32 : i32
    %1 = arith.extui %0 : i1 to i32
    %c0_i32_0 = arith.constant 0 : i32
    %2 = arith.cmpi ne, %1, %c0_i32_0 : i32
    scf.if %2 {
      %cst_8 = arith.constant 0.000000e+00 : f32
      %11 = vector.broadcast %cst_8 : f32 to vector<128x128xf32>
      %c0_9 = arith.constant 0 : index
      %c0_10 = arith.constant 0 : index
      %c0_11 = arith.constant 0 : index
      %12 = vector.load %arg4[%c0_9, %c0_10, %c0_11] : memref<1x128x128xf32, #tpu.memory_space<vmem>>, vector<1x128x128xf32>
      %13 = vector.shape_cast %12 : vector<1x128x128xf32> to vector<128x128xf32>
      %14 = vector.shape_cast %11 : vector<128x128xf32> to vector<1x128x128xf32>
      tpu.vector_store %arg4[%c0_9, %c0_10, %c0_11], %14 {strides = array<i32>} : memref<1x128x128xf32, #tpu.memory_space<vmem>>, vector<1x128x128xf32>,
    } else {
    }
    %c0 = arith.constant 0 : index
    %c0_1 = arith.constant 0 : index
    %3 = vector.load %arg3[%c0, %c0_1] : memref<64x128xf32, #tpu.memory_space<vmem>>, vector<64x128xf32>
    %c0_2 = arith.constant 0 : index
    %c0_3 = arith.constant 0 : index
    %c0_4 = arith.constant 0 : index
    %4 = vector.load %arg4[%c0_2, %c0_3, %c0_4] : memref<1x128x128xf32, #tpu.memory_space<vmem>>, vector<1x128x128xf32>
    %5 = vector.shape_cast %4 : vector<1x128x128xf32> to vector<128x128xf32>
    %cst = arith.constant dense<0.000000e+00> : vector<128x128xf32>
    %6 = tpu.matmul %3, %3, %cst {dimension_numbers = #tpu.dot_dimension_numbers<[0], [0], [1], [1], [0, 1, 1, 1], [], []>} : vector<64x128xf32>, vector<64x128xf32>, vector<128x128xf32> -> vector<128x128xf32>
    %7 = arith.addf %5, %6 : vector<128x128xf32>
    %c0_5 = arith.constant 0 : index
    %c0_6 = arith.constant 0 : index
    %c0_7 = arith.constant 0 : index
    %8 = vector.load %arg4[%c0_5, %c0_6, %c0_7] : memref<1x128x128xf32, #tpu.memory_space<vmem>>, vector<1x128x128xf32>
    %9 = vector.shape_cast %8 : vector<1x128x128xf32> to vector<128x128xf32>
    %10 = vector.shape_cast %7 : vector<128x128xf32> to vector<1x128x128xf32>
    tpu.vector_store %arg4[%c0_5, %c0_6, %c0_7], %10 {strides = array<i32>} : memref<1x128x128xf32, #tpu.memory_space<vmem>>, vector<1x128x128xf32>,
    return
  }
  func.func @transform_0(%arg0: i32, %arg1: i32, %arg2: i32) -> (i32, i32) {
    %c2_i32 = arith.constant 2 : i32
    %0 = arith.muli %arg0, %c2_i32 : i32
    %1 = arith.addi %0, %arg2 : i32
    %c0_i32 = arith.constant 0 : i32
    %c0_i32_0 = arith.constant 0 : i32
    return %1, %c0_i32 : i32, i32
  }
  func.func @transform_1(%arg0: i32, %arg1: i32, %arg2: i32) -> (i32, i32, i32) {
    %c0_i32 = arith.constant 0 : i32
    %c0_i32_0 = arith.constant 0 : i32
    return %arg0, %c0_i32, %arg1 : i32, i32, i32
  }
}

</mosaic_0001>

<bundles_post_ra>
// kernel: tpu_custom_call.1
= control target key start
LH: loop header
LB: loop body
LE: loop exit
PB: predicated region body
PF: predicated region fallthrough
CT: control target
= control target key end

     0   :  { %6 = vsyncpa [#allocation3], 0  ;;  %s1285_s0 = inlined_call_operand.hbm [shape: f32[256,128], index: 0, kind: input, shape index: {}]   ;;  %s1286_s1 = inlined_call_operand.hbm [shape: f32[2,128,128], index: 1, kind: output, shape index: {}]  }
   0x1   :  { %8 = vsyncpa [#allocation3 + $0x1], 0 }
   0x2   :  { %9 = vsyncpa [#allocation4], 0 }
   0x3   :  { %11 = vsyncpa [#allocation4 + $0x1], 0  ;;  %s977_s6 = smov 0   ;;  %s979_s7 = smov 0  }
   0x4   :  { %s981_s8 = smov 0   ;;  %s983_s9 = smov 0  }
   0x5   :  { %s985_s10 = smov 0   ;;  %s987_s11 = smov 0  }
   0x6   :  { %s989_s12 = smov 0   ;;  %s991_s13 = smov 0  }
   0x7   :  { %s993_s14 = smov 0   ;;  %s995_s15 = smov 0  }
   0x8   :  { %s997_s16 = smov 0  }
   0x9 LB: > { %s573_s17 = sadd.s32 4294967295, %s958_s16   ;;  %s574_s18 = sadd.s32 4294967294, %s958_s16   ;;  %s958_s16 = sphi %s997_s16, %s17_s16   ;;  %s954_s15 = sphi %s995_s15, %s1304_s15   ;;  %s950_s14 = sphi %s993_s14, %s1303_s14   ;;  %s946_s13 = sphi %s991_s13, %s1302_s13   ;;  %s942_s12 = sphi %s989_s12, %s1301_s12   ;;  %s938_s11 = sphi %s987_s11, %s1300_s11   ;;  %s934_s10 = sphi %s985_s10, %s1299_s10   ;;  %s930_s9 = sphi %s983_s9, %s1298_s9   ;;  %s926_s8 = sphi %s981_s8, %s1297_s8   ;;  %s922_s7 = sphi %s979_s7, %s1296_s7   ;;  %s918_s6 = sphi %s977_s6, %s1295_s6  }
   0xa   : > { %s29_s19 = sadd.s32 1, %s950_s14  ;;  %s36_s20 = sadd.s32 1, %s954_s15 }
   0xb   : > { %p30_p0 = scmp.ge.s32.totalorder %s29_s19, 2  ;;  %s575_s21 = sshll.u32 %s954_s15, 1 }
   0xc   : > { %s1036_s22 = sadd.s32 %s950_s14, %s575_s21  ;;  %s47_s23 = sadd.s32 1, %s938_s11 }
   0xd   : > { %s1306_s19 = smov (%p30_p0, %s29_s19), 0  ;;  %s1308_s20 = smov (!%p30_p0, %s36_s20), %s954_s15 }
   0xe   : > { %p54_p1 = scmp.ne.s32.totalorder %s938_s11, %s934_s10  ;;  %p55_p2 = scmp.eq.s32.totalorder %s958_s16, 0 }
   0xf   : > { %p38_p3 = scmp.ge.s32.totalorder %s1308_s20, 2  ;;  %p60_p4 = scmp.ne.s32.totalorder %s934_s10, %s930_s9 }
  0x10   : > { %p1046_p5 = por %p55_p2, %p54_p1  ;;  %p61_p6 = scmp.eq.s32.totalorder %s573_s17, 0 }
  0x11   : > { %s1310_s20 = smov (%p38_p3, %s1308_s20), 0  ;;  %s75_s26 = sadd.s32 1, %s926_s8 }
  0x12   : > { %p1052_p7 = por %p61_p6, %p60_p4  ;;  %s576_s27 = sshll.u32 %s1310_s20, 1 }
  0x13   : > { %s70_s28 = ssub.s32 %s954_s15, %s1310_s20  ;;  %s43_s29 = sadd.s32 %s576_s27, %s1306_s19 }
  0x14   : > { %p73_p8 = scmp.eq.s32.totalorder %s70_s28, 0  ;;  %s44_s30 = ssub.s32 %s1036_s22, %s43_s29 }
  0x15   : > { %p85_p9 = scmp.ne.s32.totalorder %s926_s8, %s922_s7  ;;  %p45_p10 = scmp.eq.s32.totalorder %s44_s30, 0 }
  0x16   : > { %p86_p11 = scmp.eq.s32.totalorder %s573_s17, 3  ;;  %p91_p13 = scmp.ne.s32.totalorder %s922_s7, %s918_s6 }
  0x17   : > { %s1065_s2 = scalar_select %p73_p8, %s926_s8, %s75_s26  }
  0x18   : > { %s1068_s3 = scalar_select %p45_p10, %s938_s11, %s47_s23  }
  0x19   : > { %p1070_p12 = por %p86_p11, %p85_p9  ;;  %p92_p0 = scmp.eq.s32.totalorder %s574_s18, 3 }
  0x1a   : > { %p710_p1 = scmp.lt.s32.totalorder %s958_s16, 4  ;;  %s112_s5 = sand.u32 1, %s938_s11  }
  0x1b   : > { %s1290_s4 = scalar_select %p1070_p12, 1, 0 }
  0x1c   : > { %p1080_p2 = por %p92_p0, %p91_p13  ;;  %s579_s21 = sshll.u32 %s112_s5, 6 }
  0x1d   : > { %s608_s27 = sshll.u32 %s1036_s22, 10  ;;  %s116_s28 = scalar_lea.vmem [#allocation2], %s579_s21 }
  0x1e   : > { %s1291_s9 = scalar_select %p1080_p2, 1, 0 }
  0x1f   : > { %s1088_s23 = scalar_lea.hbm %s1285_s0, %s608_s27  ;;  %s125_s29 = sshll.u32 %s116_s28, 4  ;;  %s1096_s29 = int_to_ptr.vmem [resolvable:$true] %s125_s29 }
  0x20   : > { %p1092_p3 = pnand %p710_p1, %p1046_p5  ;;  %s1098_s22 = scalar_lea.sflag [#allocation3], %s112_s5 }
  0x21   : > { %s806_s30 = scalar_lea.hbm %s1088_s23, 1024  ;;  %s811_s27 = scalar_lea.hbm %s1285_s0, 4096 }
  0x22   : > { %p807_p4 = scmp.ne.s32.totalorder %s1088_s23, %s806_s30  ;;  %p808_p6 = pneg %p1092_p3 }
  0x23   : > { %p812_p5 = scmp.lt.u32.totalorder %s1088_s23, %s1285_s0  ;;  %p813_p10 = scmp.lt.u32.totalorder %s811_s27, %s806_s30 }
  0x24   : > { %p809_p8 = pnand %p808_p6, %p807_p4  ;;  %p815_p13 = scmp.lt.u32.totalorder %s806_s30, %s1088_s23 }
  0x25   : > { %p814_p11 = por %p813_p10, %p812_p5 }
  0x26   : > { %p810_p9 = pneg %p809_p8 }
  0x27   : > { %p816_p0 = por %p815_p13, %p814_p11 }
  0x29   : > { %p817_p1 = pnand %p816_p0, %p810_p9 }
  0x2b   : > { %820 = shalt.err (!%p817_p1)
}
  0x2c   : > { %s821_s5 = scalar_lea.vmem %s1096_s29, 1024  ;;  %s960_s28 = smov [#allocation2]  }
  0x2d   : > { %p822_p4 = scmp.ne.s32.totalorder %s1096_s29, %s821_s5  ;;  %s826_s21 = sshll.u32 %s960_s28, 4  ;;  %s827_s21 = int_to_ptr.vmem [resolvable:$false] %s826_s21 }
  0x2e   : > { %s828_s24 = scalar_lea.vmem %s827_s21, 2048  ;;  %p829_p12 = scmp.lt.s32.totalorder %s1096_s29, %s827_s21 }
  0x2f   : > { %p824_p8 = pnand %p822_p4, %p808_p6  ;;  %p830_p5 = scmp.lt.s32.totalorder %s828_s24, %s821_s5 }
  0x31   : > { %p825_p2 = pneg %p824_p8  ;;  %p831_p10 = por %p830_p5, %p829_p12 }
  0x33   : > { %p832_p11 = pnand %p831_p10, %p825_p2 }
  0x35   : > { %835 = shalt.err (!%p832_p11)
}
  0x36   : > { %s961_s30 = smov 128   ;;  %s962_s27 = smov 8  }
  0x37   : > { %705 = dma.hbm_to_vmem [thread:$0]  (!%p1092_p3), %s1088_s23, 1024, %s1096_s29, %s1098_s22, %s961_s30, %s961_s30, %s962_s27  }
  0x38   : > { %p583_p6 = scmp.ge.s32.totalorder %s958_s16, 1  ;;  %p133_p9 = scmp.lt.s32.totalorder %s958_s16, 5 }
  0x3a   : > { %p134_p13 = pnand %p583_p6, %p133_p9 }
  0x3b   : > { %s139_s17 = sand.u32 (!%p134_p13), 1, %s934_s10  }
  0x3c   : > { %137 = sbr.rel (%p134_p13) target bundleno = 499 (0x1f3), region = 24  ;;  %s584_s26 = sshll.u32 (!%p134_p13), %s139_s17, 6 }
  0x3d   : > { %s140_s5 = scalar_lea.sflag (!%p134_p13), [#allocation3], %s139_s17  ;;  %s1129_s28 = scalar_lea.vmem (!%p134_p13), [#allocation2], %s584_s26 }
  0x43   : > { %909 = dma.done.wait (%p1052_p7), %s140_s5, 1024  }
  0x44   : > { %911 = vsyncadd (%p1052_p7), %s140_s5, 4294966272  ;;  %s159_s18 = sand.u32 1, %s922_s7   ;;  %p586_p12 = scmp.ne.s32.totalorder %s942_s12, 0 }
  0x45   : > { %s585_s23 = sshll.u32 %s159_s18, 7  ;;  %v963_v0 = vmov (!%p586_p12), 0.0  }
  0x46   : > { %s1138_s29 = scalar_lea.vmem [#allocation5], %s585_s23  ;;  %168 = sbr.rel (%p586_p12) target bundleno = 79 (0x4f), region = 32 }
  0x47   : > { %169 = vst [vmem:[%s1138_s29] sm:$0xff] (!%p586_p12), %v963_v0  ;;  %170 = vst [vmem:[%s1138_s29 + $0x8] sm:$0xff] (!%p586_p12), %v963_v0 }
  0x48   : > { %171 = vst [vmem:[%s1138_s29 + $0x10] sm:$0xff] (!%p586_p12), %v963_v0  ;;  %172 = vst [vmem:[%s1138_s29 + $0x18] sm:$0xff] (!%p586_p12), %v963_v0 }
  0x49   : > { %173 = vst [vmem:[%s1138_s29 + $0x20] sm:$0xff] (!%p586_p12), %v963_v0  ;;  %174 = vst [vmem:[%s1138_s29 + $0x28] sm:$0xff] (!%p586_p12), %v963_v0 }
  0x4a   : > { %175 = vst [vmem:[%s1138_s29 + $0x30] sm:$0xff] (!%p586_p12), %v963_v0  ;;  %176 = vst [vmem:[%s1138_s29 + $0x38] sm:$0xff] (!%p586_p12), %v963_v0 }
  0x4b   : > { %177 = vst [vmem:[%s1138_s29 + $0x40] sm:$0xff] (!%p586_p12), %v963_v0  ;;  %178 = vst [vmem:[%s1138_s29 + $0x48] sm:$0xff] (!%p586_p12), %v963_v0 }
  0x4c   : > { %179 = vst [vmem:[%s1138_s29 + $0x50] sm:$0xff] (!%p586_p12), %v963_v0  ;;  %180 = vst [vmem:[%s1138_s29 + $0x58] sm:$0xff] (!%p586_p12), %v963_v0 }
  0x4d   : > { %181 = vst [vmem:[%s1138_s29 + $0x60] sm:$0xff] %v963_v0  ;;  %182 = vst [vmem:[%s1138_s29 + $0x68] sm:$0xff] %v963_v0 }
  0x4e   : > { %183 = vst [vmem:[%s1138_s29 + $0x70] sm:$0xff] %v963_v0  ;;  %184 = vst [vmem:[%s1138_s29 + $0x78] sm:$0xff] %v963_v0 }
  0x4f PF: > { %v185_v1 = vld [vmem:[%s1129_s28] sm:$0xff]  ;;  %v186_v2 = vld [vmem:[%s1129_s28 + $0x8] sm:$0xff]  ;;  %v187_v4 = vld [vmem:[%s1129_s28 + $0x10] sm:$0xff]  ;;  %vm241_vm0 = vcmask 523264   ;;  %s609_s12 = sshll.u32 %s946_s13, 11  ;;  %s482_s25 = sshll.u32 %s1138_s29, 4  ;;  %s1218_s25 = int_to_ptr.vmem [resolvable:$true] %s482_s25 }
  0x50   : > { %209 = vxpose.xlu0.b32.start [1/8] (short) %v185_v1, 128  ;;  %v674_v3 = vpack.c.bf16 %v186_v2, %v185_v1  ;;  %v188_v5 = vld [vmem:[%s1129_s28 + $0x18] sm:$0xff]  ;;  %v189_v7 = vld [vmem:[%s1129_s28 + $0x20] sm:$0xff]  ;;  %v190_v8 = vld [vmem:[%s1129_s28 + $0x28] sm:$0xff]  ;;  %s1216_s24 = scalar_lea.hbm %s1286_s1, %s609_s12  ;;  %s1224_s13 = scalar_lea.sflag [#allocation4], %s159_s18 }
  0x51   : > { %v678_v6 = vpack.c.bf16 %v188_v5, %v187_v4  ;;  %v682_v9 = vpack.c.bf16 %v190_v8, %v189_v7  ;;  %v191_v10 = vld [vmem:[%s1129_s28 + $0x30] sm:$0xff]  ;;  %v192_v11 = vld [vmem:[%s1129_s28 + $0x38] sm:$0xff]  ;;  %v194_v29 = vld [vmem:[%s1138_s29 + $0x8] sm:$0xff]  ;;  %s836_s30 = scalar_lea.vmem %s1218_s25, 2048  ;;  %p1293_p2 = scmp.ne.s32.totalorder %s1290_s4, 0 }
  0x52   : > { %675 = vmatprep.subr.bf16.mxu0 %v674_v3  ;;  %690 = vmatprep.subr.bf16.mxu1 %v674_v3  ;;  %v686_v12 = vpack.c.bf16 %v192_v11, %v191_v10  ;;  %v193_v30 = vld [vmem:[%s1138_s29] sm:$0xff]  ;;  %v196_v35 = vld [vmem:[%s1138_s29 + $0x18] sm:$0xff]  ;;  %v195_v36 = vld [vmem:[%s1138_s29 + $0x10] sm:$0xff]  ;;  %p837_p7 = scmp.ne.s32.totalorder %s1218_s25, %s836_s30  ;;  %s964_s27 = smov [#allocation5]  }
  0x53   : > { %677 = vmatpush3.bf16.msra.mxu0 %v674_v3  ;;  %694 = vmatpush3.bf16.msra.mxu1 %v674_v3  ;;  %v198_v41 = vld [vmem:[%s1138_s29 + $0x28] sm:$0xff]  ;;  %v197_v42 = vld [vmem:[%s1138_s29 + $0x20] sm:$0xff]  ;;  %v200_v47 = vld [vmem:[%s1138_s29 + $0x38] sm:$0xff]  ;;  %s840_s17 = sshll.u32 %s964_s27, 4  ;;  %s841_s17 = int_to_ptr.vmem [resolvable:$false] %s840_s17 }
  0x54   : > { %210 = vxpose.xlu0.b32.cont [2/8] (short) %v186_v2, 128  ;;  %679 = vmatprep.subr.bf16.mxu0 %v678_v6  ;;  %v199_v48 = vld [vmem:[%s1138_s29 + $0x30] sm:$0xff]  ;;  %v202_v53 = vld [vmem:[%s1138_s29 + $0x48] sm:$0xff]  ;;  %v201_v54 = vld [vmem:[%s1138_s29 + $0x40] sm:$0xff]  ;;  %p838_p3 = pnand %p837_p7, %p1293_p2  ;;  %s842_s26 = scalar_lea.vmem %s841_s17, 4096 }
  0x55   : > { %691 = vmatprep.subr.bf16.mxu1 %v678_v6  ;;  %v204_v59 = vld [vmem:[%s1138_s29 + $0x58] sm:$0xff]  ;;  %v203_v60 = vld [vmem:[%s1138_s29 + $0x50] sm:$0xff]  ;;  %v206_v1 = vld [vmem:[%s1138_s29 + $0x68] sm:$0xff]  ;;  %p843_p1 = scmp.lt.s32.totalorder %s1218_s25, %s841_s17  ;;  %p844_p4 = scmp.lt.s32.totalorder %s842_s26, %s836_s30 }
  0x56   : > { %v205_v2 = vld [vmem:[%s1138_s29 + $0x60] sm:$0xff]  ;;  %p839_p0 = pneg %p838_p3 }
  0x57   : > { %681 = vmatpush3.bf16.msra.mxu0 %v678_v6  ;;  %695 = vmatpush3.bf16.msra.mxu1 %v678_v6  ;;  %p845_p8 = por %p844_p4, %p843_p1 }
  0x58   : > { %211 = vxpose.xlu0.b32.cont [3/8] (short) %v187_v4, 128  ;;  %683 = vmatprep.subr.bf16.mxu0 %v682_v9 }
  0x59   : > { %692 = vmatprep.subr.bf16.mxu1 %v682_v9  ;;  %p846_p5 = pnand %p845_p8, %p839_p0 }
  0x5b   : > { %685 = vmatpush3.bf16.msra.mxu0 %v682_v9  ;;  %696 = vmatpush3.bf16.msra.mxu1 %v682_v9 }
  0x5c   : > { %212 = vxpose.xlu0.b32.cont [4/8] (short) %v188_v5, 128  ;;  %687 = vmatprep.subr.bf16.mxu0 %v686_v12 }
  0x5d   : > { %693 = vmatprep.subr.bf16.mxu1 %v686_v12 }
  0x5f   : > { %689 = vmatpush3.bf16.msra.mxu0 %v686_v12  ;;  %697 = vmatpush3.bf16.msra.mxu1 %v686_v12 }
  0x60   : > { %213 = vxpose.xlu0.b32.cont [5/8] (short) %v189_v7, 128  ;;  %v208_v7 = vld [vmem:[%s1138_s29 + $0x78] sm:$0xff] }
  0x64   : > { %214 = vxpose.xlu0.b32.cont [6/8] (short) %v190_v8, 128  ;;  %v207_v8 = vld [vmem:[%s1138_s29 + $0x70] sm:$0xff] }
  0x68   : > { %215 = vxpose.xlu0.b32.cont [7/8] (short) %v191_v10, 128 }
  0x6c   : > { %216 = vxpose.xlu0.b32.end [8/8] (short) %v192_v11, 128 }
  0xd0   : > { %v225_v13 = vpop.trf.xlu0 }
  0xd1   : > { %650 = vmatprep.mubr.msk.f32.mxu0 %vm241_vm0, %v225_v13 }
  0xd4   : > { %v226_v14 = vpop.trf.xlu0 }
  0xd5   : > { %651 = vmatmul.mubr.msk.f32.vlgmr.msra.gmra.mrb[0].mxu0 %vm241_vm0, %v226_v14 }
  0xd8   : > { %v227_v15 = vpop.trf.xlu0 }
  0xd9   : > { %653 = vmatprep.mubr.msk.f32.mxu0 %vm241_vm0, %v227_v15 }
  0xdc   : > { %v228_v16 = vpop.trf.xlu0 }
  0xdd   : > { %654 = vmatmul.mubr.msk.f32.gmra.mrb[2].mxu0 %vm241_vm0, %v228_v16 }
  0xe0   : > { %v229_v17 = vpop.trf.xlu0 }
  0xe1   : > { %656 = vmatprep.mubr.msk.f32.mxu0 %vm241_vm0, %v229_v17 }
  0xe4   : > { %v230_v18 = vpop.trf.xlu0 }
  0xe5   : > { %657 = vmatmul.mubr.msk.f32.gmra.mrb[4].mxu0 %vm241_vm0, %v230_v18 }
  0xe8   : > { %v231_v19 = vpop.trf.xlu0 }
  0xe9   : > { %659 = vmatprep.mubr.msk.f32.mxu0 %vm241_vm0, %v231_v19 }
  0xec   : > { %v232_v20 = vpop.trf.xlu0 }
  0xed   : > { %660 = vmatmul.mubr.msk.f32.gmra.mrb[6].mxu0 %vm241_vm0, %v232_v20 }
  0xf0   : > { %v233_v21 = vpop.trf.xlu0 }
  0xf1   : > { %662 = vmatprep.mubr.msk.f32.mxu1 %vm241_vm0, %v233_v21 }
  0xf4   : > { %v234_v22 = vpop.trf.xlu0 }
  0xf5   : > { %663 = vmatmul.mubr.msk.f32.vlgmr.msra.gmra.mrb[0].mxu1 %vm241_vm0, %v234_v22 }
  0xf8   : > { %v235_v23 = vpop.trf.xlu0 }
  0xf9   : > { %665 = vmatprep.mubr.msk.f32.mxu1 %vm241_vm0, %v235_v23 }
  0xfc   : > { %v236_v24 = vpop.trf.xlu0 }
  0xfd   : > { %666 = vmatmul.mubr.msk.f32.gmra.mrb[2].mxu1 %vm241_vm0, %v236_v24 }
 0x100   : > { %v237_v25 = vpop.trf.xlu0 }
 0x101   : > { %668 = vmatprep.mubr.msk.f32.mxu1 %vm241_vm0, %v237_v25 }
 0x104   : > { %v238_v26 = vpop.trf.xlu0 }
 0x105   : > { %669 = vmatmul.mubr.msk.f32.gmra.mrb[4].mxu1 %vm241_vm0, %v238_v26 }
 0x108   : > { %v239_v27 = vpop.trf.xlu0 }
 0x109   : > { %671 = vmatprep.mubr.msk.f32.mxu1 %vm241_vm0, %v239_v27 }
 0x10c   : > { %v240_v28 = vpop.trf.xlu0 }
 0x10d   : > { %672 = vmatmul.mubr.msk.f32.gmra.mrb[6].mxu1 %vm241_vm0, %v240_v28 }
 0x1a8   : > { %v652_v31 = vpop.f32.mrb[0].mxu0 }
 0x1a9   : > { %v436_v32 = vadd.f32 %v652_v31, %v194_v29  ;;  %v356_v33 = vpop.f32.mrb[1].mxu0 }
 0x1aa   : > { %v435_v34 = vadd.f32 %v356_v33, %v193_v30 }
 0x1ab   : > { %452 = vst [vmem:[%s1138_s29 + $0x8] sm:$0xff] %v436_v32 }
 0x1ac   : > { %451 = vst [vmem:[%s1138_s29] sm:$0xff] %v435_v34 }
 0x1b0   : > { %v655_v37 = vpop.f32.mrb[2].mxu0 }
 0x1b1   : > { %v438_v38 = vadd.f32 %v655_v37, %v196_v35  ;;  %v366_v39 = vpop.f32.mrb[3].mxu0 }
 0x1b2   : > { %v437_v40 = vadd.f32 %v366_v39, %v195_v36 }
 0x1b3   : > { %454 = vst [vmem:[%s1138_s29 + $0x18] sm:$0xff] %v438_v38 }
 0x1b4   : > { %453 = vst [vmem:[%s1138_s29 + $0x10] sm:$0xff] %v437_v40 }
 0x1b8   : > { %v658_v43 = vpop.f32.mrb[4].mxu0 }
 0x1b9   : > { %v440_v44 = vadd.f32 %v658_v43, %v198_v41  ;;  %v376_v45 = vpop.f32.mrb[5].mxu0 }
 0x1ba   : > { %v439_v46 = vadd.f32 %v376_v45, %v197_v42 }
 0x1bb   : > { %456 = vst [vmem:[%s1138_s29 + $0x28] sm:$0xff] %v440_v44 }
 0x1bc   : > { %455 = vst [vmem:[%s1138_s29 + $0x20] sm:$0xff] %v439_v46 }
 0x1c0   : > { %v661_v49 = vpop.f32.mrb[6].mxu0 }
 0x1c1   : > { %v442_v50 = vadd.f32 %v661_v49, %v200_v47  ;;  %v386_v51 = vpop.f32.mrb[7].mxu0 }
 0x1c2   : > { %v441_v52 = vadd.f32 %v386_v51, %v199_v48 }
 0x1c3   : > { %458 = vst [vmem:[%s1138_s29 + $0x38] sm:$0xff] %v442_v50 }
 0x1c4   : > { %457 = vst [vmem:[%s1138_s29 + $0x30] sm:$0xff] %v441_v52 }
 0x1c8   : > { %v664_v55 = vpop.f32.mrb[0].mxu1 }
 0x1c9   : > { %v444_v56 = vadd.f32 %v664_v55, %v202_v53  ;;  %v396_v57 = vpop.f32.mrb[1].mxu1 }
 0x1ca   : > { %v443_v58 = vadd.f32 %v396_v57, %v201_v54 }
 0x1cb   : > { %460 = vst [vmem:[%s1138_s29 + $0x48] sm:$0xff] %v444_v56 }
 0x1cc   : > { %459 = vst [vmem:[%s1138_s29 + $0x40] sm:$0xff] %v443_v58 }
 0x1d0   : > { %v667_v61 = vpop.f32.mrb[2].mxu1 }
 0x1d1   : > { %v446_v62 = vadd.f32 %v667_v61, %v204_v59  ;;  %v406_v63 = vpop.f32.mrb[3].mxu1 }
 0x1d2   : > { %v445_v0 = vadd.f32 %v406_v63, %v203_v60 }
 0x1d3   : > { %462 = vst [vmem:[%s1138_s29 + $0x58] sm:$0xff] %v446_v62 }
 0x1d4   : > { %461 = vst [vmem:[%s1138_s29 + $0x50] sm:$0xff] %v445_v0 }
 0x1d8   : > { %v670_v3 = vpop.f32.mrb[4].mxu1 }
 0x1d9   : > { %v448_v4 = vadd.f32 %v670_v3, %v206_v1  ;;  %v416_v5 = vpop.f32.mrb[5].mxu1 }
 0x1da   : > { %v447_v6 = vadd.f32 %v416_v5, %v205_v2 }
 0x1db   : > { %464 = vst [vmem:[%s1138_s29 + $0x68] sm:$0xff] %v448_v4 }
 0x1dc   : > { %463 = vst [vmem:[%s1138_s29 + $0x60] sm:$0xff] %v447_v6 }
 0x1e0   : > { %v673_v9 = vpop.f32.mrb[6].mxu1 }
 0x1e1   : > { %v450_v10 = vadd.f32 %v673_v9, %v208_v7  ;;  %v426_v11 = vpop.f32.mrb[7].mxu1 }
 0x1e2   : > { %v449_v12 = vadd.f32 %v426_v11, %v207_v8 }
 0x1e3   : > { %466 = vst [vmem:[%s1138_s29 + $0x78] sm:$0xff] %v450_v10 }
 0x1e4   : > { %465 = vst [vmem:[%s1138_s29 + $0x70] sm:$0xff] %v449_v12 }
 0x1e5   : > { %849 = shalt.err (!%p846_p5)
}
 0x1e6   : > { %s850_s5 = scalar_lea.hbm %s1216_s24, 2048  ;;  %s854_s23 = scalar_lea.hbm %s1286_s1, 4096 }
 0x1e7   : > { %p851_p10 = scmp.ne.s32.totalorder %s1216_s24, %s850_s5  ;;  %p855_p9 = scmp.lt.u32.totalorder %s1216_s24, %s1286_s1 }
 0x1e8   : > { %p856_p13 = scmp.lt.u32.totalorder %s854_s23, %s850_s5  ;;  %p858_p7 = scmp.lt.u32.totalorder %s850_s5, %s1216_s24 }
 0x1e9   : > { %p852_p11 = pnand %p851_p10, %p1293_p2 }
 0x1ea   : > { %p857_p12 = por %p856_p13, %p855_p9 }
 0x1eb   : > { %p853_p6 = pneg %p852_p11 }
 0x1ec   : > { %p859_p3 = por %p858_p7, %p857_p12 }
 0x1ee   : > { %p860_p0 = pnand %p859_p3, %p853_p6 }
 0x1f0   : > { %863 = shalt.err (!%p860_p0)
}
 0x1f1   : > { %s965_s22 = smov 128   ;;  %s966_s21 = smov 8  }
 0x1f2   : > { %700 = dma.vmem_to_hbm [thread:$0]  (%p1293_p2), %s1218_s25, 2048, %s1216_s24, %s1224_s13, %s965_s22, %s965_s22, %s966_s21  }
 0x1f3 PF: > { %p711_p1 = scmp.ge.s32.totalorder %s958_s16, 2  ;;  %s497_s30 = sand.u32 1, %s918_s6  }
 0x1f4   : > { %p1294_p4 = scmp.ne.s32.totalorder %s1291_s9, 0  ;;  %s498_s27 = scalar_lea.sflag [#allocation4], %s497_s30 }
 0x1f6   : > { %p707_p8 = pnand %p711_p1, %p1294_p4 }
 0x1f8   : > { %913 = dma.done.wait (!%p707_p8), %s498_s27, 2048  }
 0x1f9   : > { %915 = vsyncadd (!%p707_p8), %s498_s27, 4294965248  ;;  %s17_s16 = sadd.s32 1, %s958_s16   ;;  %s1295_s6 = smov %s922_s7 }
 0x1fa   : > { %p14_p5 = scmp.ge.s32.totalorder %s17_s16, 6   ;;  %s1296_s7 = smov %s926_s8 }
 0x1fb   : > { %s1297_s8 = smov %s1065_s2  ;;  %s1298_s9 = smov %s934_s10 }
 0x1fc   : > { %s1299_s10 = smov %s938_s11  ;;  %s1300_s11 = smov %s1068_s3 }
 0x1fd   : > { %s1301_s12 = smov %s950_s14  ;;  %s1302_s13 = smov %s954_s15 }
 0x1fe   : > { %s1303_s14 = smov %s1306_s19  ;;  %s1304_s15 = smov %s1310_s20 }
 0x1ff   :  { %16 = sbr.rel (!%p14_p5) target bundleno = 9 (0x9), region = 73 }
 0x206   :  { %503 = vsyncpa [#allocation3], 1 }
 0x207   :  { %505 = vsyncpa [#allocation3 + $0x1], 1 }
 0x208   :  { %506 = vsyncpa [#allocation4], 1 }
 0x209   :  { %508 = vsyncpa [#allocation4 + $0x1], 1 }

</bundles_post_ra>
